<compile_context>
chip_gen: v7x
topology: tpu7x:2x2x1
jax: 0.10.0
libtpu: 0.0.40
codegen_flags: <defaults>
</compile_context>

<pallas_src>
import functools

import jax
import jax.numpy as jnp
from jax.experimental import pallas as pl
from jax.experimental.pallas import tpu as pltpu


def _round_up(x: int, m: int) -> int:
    return ((x + m - 1) // m) * m


_VMEM_LIMIT = 32 * 1024 * 1024  # safe on v5e/v6e (128 MiB) and v7x (64 MiB)


# --------------------------------------------------------------------------
# Small-graph path: one fused kernel, everything resident in VMEM.
#   out = adj @ (x @ w) + bias
# --------------------------------------------------------------------------
def _fused_kernel(x_ref, w_ref, adj_ref, b_ref, o_ref):
    support = jnp.dot(x_ref[...], w_ref[...], preferred_element_type=jnp.float32)
    o_ref[...] = (
        jnp.dot(adj_ref[...], support, preferred_element_type=jnp.float32)
        + b_ref[...]
    ).astype(o_ref.dtype)


def _gcn_fused_small(x, adj, weight, bias, n_p, f_in_p, f_out_p):
    N, f_in = x.shape
    f_out = weight.shape[1]

    x_p = jnp.zeros((n_p, f_in_p), jnp.float32).at[:N, :f_in].set(
        x.astype(jnp.float32))
    adj_p = jnp.zeros((n_p, n_p), jnp.float32).at[:N, :N].set(
        adj.astype(jnp.float32))
    w_p = jnp.zeros((f_in_p, f_out_p), jnp.float32).at[:f_in, :f_out].set(
        weight.astype(jnp.float32))
    b_p = jnp.zeros((1, f_out_p), jnp.float32).at[0, :f_out].set(
        bias.astype(jnp.float32))

    out_p = pl.pallas_call(
        _fused_kernel,
        out_shape=jax.ShapeDtypeStruct((n_p, f_out_p), jnp.float32),
        grid=(1,),
        in_specs=[
            pl.BlockSpec((n_p, f_in_p), lambda i: (0, 0)),
            pl.BlockSpec((f_in_p, f_out_p), lambda i: (0, 0)),
            pl.BlockSpec((n_p, n_p), lambda i: (0, 0)),
            pl.BlockSpec((1, f_out_p), lambda i: (0, 0)),
        ],
        out_specs=pl.BlockSpec((n_p, f_out_p), lambda i: (0, 0)),
        compiler_params=pltpu.CompilerParams(
            dimension_semantics=("arbitrary",),
            vmem_limit_bytes=_VMEM_LIMIT,
        ),
    )(x_p, w_p, adj_p, b_p)
    return out_p[:N, :f_out]


# --------------------------------------------------------------------------
# Large-graph path, kernel 1: support = X @ W (bf16 in, f32 acc, bf16 out)
# --------------------------------------------------------------------------
def _support_kernel(x_ref, w_ref, o_ref):
    o_ref[...] = jnp.dot(
        x_ref[...], w_ref[...], preferred_element_type=jnp.float32
    ).astype(o_ref.dtype)


# --------------------------------------------------------------------------
# Large-graph path, kernel 2: out = adj @ support + bias
#   grid = (row_tiles, k_tiles), reduction axis last ("arbitrary").
#   The f32 output block is resident across k: init with bias at k == 0 and
#   accumulate directly into it (no separate scratch, no final copy).
# --------------------------------------------------------------------------
def _aggregate_resident_kernel(tk, adj_ref, s_ref, b_ref, o_ref):
    # `s_ref` holds the FULL support array (fetched once, stays in VMEM).
    k = pl.program_id(1)

    @pl.when(k == 0)
    def _():
        o_ref[...] = jnp.broadcast_to(b_ref[...], o_ref.shape)

    start = pl.multiple_of(k * tk, tk)
    o_ref[...] += jnp.dot(
        adj_ref[...], s_ref[pl.ds(start, tk), :],
        preferred_element_type=jnp.float32,
    )


def _aggregate_streamed_kernel(adj_ref, s_ref, b_ref, o_ref):
    # `s_ref` is a (tk, f_out_p) tile streamed per k step.
    k = pl.program_id(1)

    @pl.when(k == 0)
    def _():
        o_ref[...] = jnp.broadcast_to(b_ref[...], o_ref.shape)

    o_ref[...] += jnp.dot(
        adj_ref[...], s_ref[...], preferred_element_type=jnp.float32
    )


def _gcn_tiled_large(x, adj, weight, bias, f_in_p, f_out_p):
    N, f_in = x.shape
    f_out = weight.shape[1]
    compute_dtype = jnp.bfloat16

    # ---- avoid the padded N^2 copy of adj when N is already lane-aligned ----
    if N % 128 == 0:
        n_p = N
        adj_used = adj  # zero-copy path: no pad pass over the dominant operand
    else:
        # TODO(synk): mask ragged edge tiles in-kernel (broadcasted_iota) to
        # avoid materializing this zero-padded copy of the N^2 adjacency.
        n_p = _round_up(N, 512)
        adj_used = jnp.zeros((n_p, n_p), adj.dtype).at[:N, :N].set(adj)

    tm = next(t for t in (512, 256, 128) if n_p % t == 0)
    tk = next(t for t in (1024, 512, 256, 128) if n_p % t == 0)

    # bf16 MXU operands (one-time casts; halve per-call HBM reads of adj and
    # support and avoid multi-pass f32 matmul decomposition).
    adj_bf = adj_used.astype(compute_dtype)
    if x.shape == (n_p, f_in_p):
        x_bf = x.astype(compute_dtype)
    else:
        x_bf = jnp.zeros((n_p, f_in_p), compute_dtype).at[:N, :f_in].set(
            x.astype(compute_dtype))
    if weight.shape == (f_in_p, f_out_p):
        w_bf = weight.astype(compute_dtype)
    else:
        w_bf = jnp.zeros((f_in_p, f_out_p), compute_dtype).at[:f_in, :f_out].set(
            weight.astype(compute_dtype))
    b_p = jnp.zeros((1, f_out_p), jnp.float32).at[0, :f_out].set(
        bias.astype(jnp.float32))

    # ---- support = X @ W (computed once, row-tiled) ----
    support = pl.pallas_call(
        _support_kernel,
        out_shape=jax.ShapeDtypeStruct((n_p, f_out_p), compute_dtype),
        grid=(n_p // tm,),
        in_specs=[
            pl.BlockSpec((tm, f_in_p), lambda i: (i, 0)),
            pl.BlockSpec((f_in_p, f_out_p), lambda i: (0, 0)),
        ],
        out_specs=pl.BlockSpec((tm, f_out_p), lambda i: (i, 0)),
        compiler_params=pltpu.CompilerParams(
            dimension_semantics=("parallel",),
            vmem_limit_bytes=_VMEM_LIMIT,
        ),
    )(x_bf, w_bf)

    # ---- out = adj @ support + bias ----
    # Keep support VMEM-resident across all row tiles when it fits the budget
    # (constant block index -> fetched exactly once); otherwise stream k tiles.
    support_bytes = n_p * f_out_p * 2  # bf16
    resident = support_bytes <= 8 * 1024 * 1024

    if resident:
        agg_kernel = functools.partial(_aggregate_resident_kernel, tk)
        s_spec = pl.BlockSpec((n_p, f_out_p), lambda i, k: (0, 0))
    else:
        agg_kernel = _aggregate_streamed_kernel
        s_spec = pl.BlockSpec((tk, f_out_p), lambda i, k: (k, 0))

    out_p = pl.pallas_call(
        agg_kernel,
        out_shape=jax.ShapeDtypeStruct((n_p, f_out_p), jnp.float32),
        grid=(n_p // tm, n_p // tk),
        in_specs=[
            pl.BlockSpec((tm, tk), lambda i, k: (i, k)),   # adj tile (bf16)
            s_spec,                                        # support (bf16)
            pl.BlockSpec((1, f_out_p), lambda i, k: (0, 0)),  # bias (f32)
        ],
        out_specs=pl.BlockSpec((tm, f_out_p), lambda i, k: (i, 0)),
        compiler_params=pltpu.CompilerParams(
            dimension_semantics=("parallel", "arbitrary"),
            vmem_limit_bytes=_VMEM_LIMIT,
        ),
    )(adj_bf, support, b_p)

    return out_p[:N, :f_out]


# --------------------------------------------------------------------------
# Public wrapper: dispatch small (fused) vs. large (tiled bf16) path.
# --------------------------------------------------------------------------
def graph_convolution(x, adj, weight, bias):
    N, f_in = x.shape
    f_out = weight.shape[1]
    assert adj.shape == (N, N)

    f_in_p = _round_up(f_in, 128)
    f_out_p = _round_up(f_out, 128)
    n_p_small = _round_up(N, 128)

    small_bytes = 4 * (n_p_small * n_p_small + n_p_small * f_in_p
                       + f_in_p * f_out_p + 2 * n_p_small * f_out_p)
    if (n_p_small <= 1024 and f_in_p <= 1024 and f_out_p <= 1024
            and small_bytes <= 12 * 1024 * 1024):
        return _gcn_fused_small(x, adj, weight, bias, n_p_small, f_in_p, f_out_p)
    return _gcn_tiled_large(x, adj, weight, bias, f_in_p, f_out_p)


if __name__ == "__main__":
    key = jax.random.PRNGKey(0)

    # ---------------- Test 1: module-sized problem (fused small path) -------
    N, F_IN, F_OUT = 16, 32, 8
    k_x, k_adj, k_w, k_b, key = jax.random.split(key, 5)

    # reset_parameters(): stdv = 1/sqrt(out_features); uniform(-stdv, stdv)
    stdv = 1.0 / (F_OUT ** 0.5)
    weight = jax.random.uniform(k_w, (F_IN, F_OUT), jnp.float32, -stdv, stdv)
    bias = jax.random.uniform(k_b, (F_OUT,), jnp.float32, -stdv, stdv)

    x = jax.random.normal(k_x, (N, F_IN), jnp.float32)
    adj_raw = jax.random.uniform(k_adj, (N, N), jnp.float32)
    adj = adj_raw / jnp.sum(adj_raw, axis=1, keepdims=True)

    out = graph_convolution(x, adj, weight, bias)
    out = jax.block_until_ready(out)
    ref = adj @ (x @ weight) + bias
    assert out.shape == (N, F_OUT)
    assert jnp.allclose(out, ref, atol=1e-4, rtol=1e-4)

    # ---------------- Test 2: large aligned graph (tiled bf16 path) ---------
    N2, F_IN2, F_OUT2 = 2048, 256, 128
    k_x2, k_adj2, k_w2, k_b2, key = jax.random.split(key, 5)

    stdv2 = 1.0 / (F_OUT2 ** 0.5)
    weight2 = jax.random.uniform(k_w2, (F_IN2, F_OUT2), jnp.float32, -stdv2, stdv2)
    bias2 = jax.random.uniform(k_b2, (F_OUT2,), jnp.float32, -stdv2, stdv2)

    x2 = jax.random.normal(k_x2, (N2, F_IN2), jnp.float32)
    adj_raw2 = jax.random.uniform(k_adj2, (N2, N2), jnp.float32)
    adj2 = adj_raw2 / jnp.sum(adj_raw2, axis=1, keepdims=True)

    out2 = graph_convolution(x2, adj2, weight2, bias2)
    out2 = jax.block_until_ready(out2)
    ref2 = adj2 @ (x2 @ weight2) + bias2
    assert out2.shape == (N2, F_OUT2)
    # bf16 MXU operands -> looser tolerance than strict f32.
    assert jnp.allclose(out2, ref2, atol=5e-3, rtol=5e-2)

    print("KERNEL_OK")
</pallas_src>

<mosaic_0001>
module attributes {stable_mosaic.version = 11 : i64} {
  func.func @_fused_kernel(%arg0: i32, %arg1: memref<128x128xf32, #tpu.memory_space<vmem>>, %arg2: memref<128x128xf32, #tpu.memory_space<vmem>>, %arg3: memref<128x128xf32, #tpu.memory_space<vmem>>, %arg4: memref<1x128xf32, #tpu.memory_space<vmem>>, %arg5: memref<128x128xf32, #tpu.memory_space<vmem>>) attributes {dimension_semantics = [#tpu.dimension_semantics<arbitrary>], iteration_bounds = array<i64: 1>, scalar_prefetch = 0 : i64, scratch_operands = 0 : i64, tpu.core_type = #tpu.core_type<tc>, window_params = [{pipeline_mode = #tpu.pipeline_mode<synchronous>, transform_indices = @transform_0, window_bounds = array<i64: 128, 128>}, {pipeline_mode = #tpu.pipeline_mode<synchronous>, transform_indices = @transform_1, window_bounds = array<i64: 128, 128>}, {pipeline_mode = #tpu.pipeline_mode<synchronous>, transform_indices = @transform_2, window_bounds = array<i64: 128, 128>}, {pipeline_mode = #tpu.pipeline_mode<synchronous>, transform_indices = @transform_3, window_bounds = array<i64: 1, 128>}, {pipeline_mode = #tpu.pipeline_mode<synchronous>, transform_indices = @transform_4, window_bounds = array<i64: 128, 128>}]} {
    %c0 = arith.constant 0 : index
    %c0_0 = arith.constant 0 : index
    %0 = vector.load %arg1[%c0, %c0_0] : memref<128x128xf32, #tpu.memory_space<vmem>>, vector<128x128xf32>
    %c0_1 = arith.constant 0 : index
    %c0_2 = arith.constant 0 : index
    %1 = vector.load %arg2[%c0_1, %c0_2] : memref<128x128xf32, #tpu.memory_space<vmem>>, vector<128x128xf32>
    %cst = arith.constant dense<0.000000e+00> : vector<128x128xf32>
    %2 = tpu.matmul %0, %1, %cst {dimension_numbers = #tpu.dot_dimension_numbers<[1], [0], [0], [1], [0, 0, 1, 1], [], []>} : vector<128x128xf32>, vector<128x128xf32>, vector<128x128xf32> -> vector<128x128xf32>
    %c0_3 = arith.constant 0 : index
    %c0_4 = arith.constant 0 : index
    %3 = vector.load %arg3[%c0_3, %c0_4] : memref<128x128xf32, #tpu.memory_space<vmem>>, vector<128x128xf32>
    %cst_5 = arith.constant dense<0.000000e+00> : vector<128x128xf32>
    %4 = tpu.matmul %3, %2, %cst_5 {dimension_numbers = #tpu.dot_dimension_numbers<[1], [0], [0], [1], [0, 0, 1, 1], [], []>} : vector<128x128xf32>, vector<128x128xf32>, vector<128x128xf32> -> vector<128x128xf32>
    %c0_6 = arith.constant 0 : index
    %c0_7 = arith.constant 0 : index
    %5 = vector.load %arg4[%c0_6, %c0_7] : memref<1x128xf32, #tpu.memory_space<vmem>>, vector<1x128xf32>
    %6 = vector.broadcast %5 : vector<1x128xf32> to vector<128x128xf32>
    %7 = arith.addf %4, %6 : vector<128x128xf32>
    %c0_8 = arith.constant 0 : index
    %c0_9 = arith.constant 0 : index
    %8 = vector.load %arg5[%c0_8, %c0_9] : memref<128x128xf32, #tpu.memory_space<vmem>>, vector<128x128xf32>
    tpu.vector_store %arg5[%c0_8, %c0_9], %7 {strides = array<i32>} : memref<128x128xf32, #tpu.memory_space<vmem>>, vector<128x128xf32>,
    return
  }
  func.func @transform_0(%arg0: i32) -> (i32, i32) {
    %c0_i32 = arith.constant 0 : i32
    %c0_i32_0 = arith.constant 0 : i32
    %c0_i32_1 = arith.constant 0 : i32
    return %c0_i32, %c0_i32_0 : i32, i32
  }
  func.func @transform_1(%arg0: i32) -> (i32, i32) {
    %c0_i32 = arith.constant 0 : i32
    %c0_i32_0 = arith.constant 0 : i32
    %c0_i32_1 = arith.constant 0 : i32
    return %c0_i32, %c0_i32_0 : i32, i32
  }
  func.func @transform_2(%arg0: i32) -> (i32, i32) {
    %c0_i32 = arith.constant 0 : i32
    %c0_i32_0 = arith.constant 0 : i32
    %c0_i32_1 = arith.constant 0 : i32
    return %c0_i32, %c0_i32_0 : i32, i32
  }
  func.func @transform_3(%arg0: i32) -> (i32, i32) {
    %c0_i32 = arith.constant 0 : i32
    %c0_i32_0 = arith.constant 0 : i32
    %c0_i32_1 = arith.constant 0 : i32
    return %c0_i32, %c0_i32_0 : i32, i32
  }
  func.func @transform_4(%arg0: i32) -> (i32, i32) {
    %c0_i32 = arith.constant 0 : i32
    %c0_i32_0 = arith.constant 0 : i32
    %c0_i32_1 = arith.constant 0 : i32
    return %c0_i32, %c0_i32_0 : i32, i32
  }
}

</mosaic_0001>

<bundles_post_ra>
// kernel: tpu_custom_call.1
= control target key start
LH: loop header
LB: loop body
LE: loop exit
PB: predicated region body
PF: predicated region fallthrough
CT: control target
= control target key end

     0   :  { %9 = vsyncpa [#allocation3], 0  ;;  %s880_s0 = inlined_call_operand.hbm [shape: f32[128,128], index: 0, kind: input, shape index: {}]   ;;  %s881_s1 = inlined_call_operand.hbm [shape: f32[128,128], index: 1, kind: input, shape index: {}]   ;;  %s882_s2 = inlined_call_operand.hbm [shape: f32[128,128], index: 2, kind: input, shape index: {}]   ;;  %s883_s3 = inlined_call_operand.vmem [shape: f32[1,128], index: 3, kind: input, shape index: {}]   ;;  %s884_s4 = inlined_call_operand.hbm [shape: f32[128,128], index: 4, kind: output, shape index: {}]  }
   0x1   :  { %10 = vsyncpa [#allocation6], 0 }
   0x2   :  { %11 = vsyncpa [#allocation4], 0  ;;  %s779_s15 = smov [#allocation5]   ;;  %s780_s17 = smov [#allocation2]  }
   0x3   :  { %s29_s16 = sshll.u32 %s779_s15, 4  ;;  %s17_s18 = sshll.u32 %s780_s17, 4  ;;  %s30_s16 = int_to_ptr.vmem [resolvable:$true] %s29_s16  ;;  %s810_s18 = int_to_ptr.vmem [resolvable:$true] %s17_s18 }
   0x4   :  { %s685_s21 = scalar_lea.hbm %s881_s1, 2048 }
   0x5   :  { %p686_p0 = scmp.ne.s32.totalorder %s881_s1, %s685_s21  ;;  %p689_p1 = scmp.lt.u32.totalorder %s685_s21, %s881_s1 }
   0x7   :  { %p691_p2 = pnand %p689_p1, %p686_p0 }
   0x9   :  { %694 = shalt.err (!%p691_p2)
}
   0xa   :  { %s695_s26 = scalar_lea.vmem %s30_s16, 2048  ;;  %p700_p4 = scmp.lt.s32.totalorder %s30_s16, %s30_s16 }
   0xb   :  { %p696_p3 = scmp.ne.s32.totalorder %s30_s16, %s695_s26  ;;  %p701_p5 = scmp.lt.s32.totalorder %s695_s26, %s695_s26 }
   0xd   :  { %p702_p6 = por %p701_p5, %p700_p4 }
   0xf   :  { %p703_p7 = pnand %p702_p6, %p696_p3 }
  0x11   :  { %706 = shalt.err (!%p703_p7)
}
  0x12   :  { %s781_s27 = smov 128   ;;  %s782_s28 = smov 8  }
  0x13   :  { %35 = dma.hbm_to_vmem [thread:$0]  %s881_s1, 2048, %s30_s16, [#allocation6], %s781_s27, %s781_s27, %s782_s28  }
  0x14   :  { %s707_s7 = scalar_lea.hbm %s880_s0, 2048 }
  0x15   :  { %p708_p8 = scmp.ne.s32.totalorder %s880_s0, %s707_s7  ;;  %p711_p9 = scmp.lt.u32.totalorder %s707_s7, %s880_s0 }
  0x17   :  { %p713_p10 = pnand %p711_p9, %p708_p8 }
  0x19   :  { %716 = shalt.err (!%p713_p10)
}
  0x1a   :  { %s717_s12 = scalar_lea.vmem %s810_s18, 2048  ;;  %p722_p12 = scmp.lt.s32.totalorder %s810_s18, %s810_s18 }
  0x1b   :  { %p718_p11 = scmp.ne.s32.totalorder %s810_s18, %s717_s12  ;;  %p723_p13 = scmp.lt.s32.totalorder %s717_s12, %s717_s12 }
  0x1d   :  { %p724_p0 = por %p723_p13, %p722_p12 }
  0x1f   :  { %p725_p1 = pnand %p724_p0, %p718_p11 }
  0x21   :  { %728 = shalt.err (!%p725_p1)
}
  0x22   :  { %23 = dma.hbm_to_vmem [thread:$0]  %s880_s0, 2048, %s810_s18, [#allocation3], %s781_s27, %s781_s27, %s782_s28  }
  0x23   :  { %s783_s14 = smov [#allocation7]   ;;  %s729_s19 = scalar_lea.hbm %s882_s2, 2048 }
  0x24   :  { %s41_s15 = sshll.u32 %s783_s14, 4  ;;  %p730_p2 = scmp.ne.s32.totalorder %s882_s2, %s729_s19  ;;  %s42_s15 = int_to_ptr.vmem [resolvable:$true] %s41_s15 }
  0x25   :  { %p733_p3 = scmp.lt.u32.totalorder %s729_s19, %s882_s2 }
  0x27   :  { %p735_p4 = pnand %p733_p3, %p730_p2 }
  0x29   :  { %738 = shalt.err (!%p735_p4)
}
  0x2a   :  { %s739_s24 = scalar_lea.vmem %s42_s15, 2048  ;;  %p744_p6 = scmp.lt.s32.totalorder %s42_s15, %s42_s15 }
  0x2b   :  { %p740_p5 = scmp.ne.s32.totalorder %s42_s15, %s739_s24  ;;  %p745_p7 = scmp.lt.s32.totalorder %s739_s24, %s739_s24 }
  0x2d   :  { %p746_p8 = por %p745_p7, %p744_p6 }
  0x2f   :  { %p747_p9 = pnand %p746_p8, %p740_p5 }
  0x31   :  { %750 = shalt.err (!%p747_p9)
}
  0x32   :  { %47 = dma.hbm_to_vmem [thread:$0]  %s882_s2, 2048, %s42_s15, [#allocation6], %s781_s27, %s781_s27, %s782_s28  }
  0x33   :  { %773 = dma.done.wait [#allocation3], 2048  }
  0x34   :  { %774 = vsyncadd [#allocation3], 4294965248 }
  0x35   :  { %775 = dma.done.wait [#allocation6], 4096  }
  0x36   :  { %776 = vsyncadd [#allocation6], 4294963200  ;;  %v75_v0 = vld [vmem:[#allocation5] sm:$0xff]  ;;  %v76_v1 = vld [vmem:[#allocation5 + $0x8] sm:$0xff] }
  0x37   :  { %v77_v2 = vld [vmem:[#allocation5 + $0x10] sm:$0xff]  ;;  %v615_v3 = vpack.c.bf16 %v76_v1, %v75_v0  ;;  %v78_v4 = vld [vmem:[#allocation5 + $0x18] sm:$0xff]  ;;  %v79_v6 = vld [vmem:[#allocation5 + $0x20] sm:$0xff] }
  0x38   :  { %v619_v5 = vpack.c.bf16 %v78_v4, %v77_v2  ;;  %v80_v7 = vld [vmem:[#allocation5 + $0x28] sm:$0xff]  ;;  %v59_v9 = vld [vmem:[#allocation2] sm:$0xff]  ;;  %v81_v10 = vld [vmem:[#allocation5 + $0x30] sm:$0xff] }
  0x39   :  { %616 = vmatprep.subr.bf16.mxu0 %v615_v3  ;;  %v623_v8 = vpack.c.bf16 %v80_v7, %v79_v6  ;;  %v82_v11 = vld [vmem:[#allocation5 + $0x38] sm:$0xff]  ;;  %535 = vmatprep.mubr.f32.mxu0 %v59_v9  ;;  %v83_v13 = vld [vmem:[#allocation5 + $0x40] sm:$0xff]  ;;  %v84_v14 = vld [vmem:[#allocation5 + $0x48] sm:$0xff] }
  0x3a   :  { %618 = vmatpush3.bf16.msra.mxu0 %v615_v3  ;;  %v627_v12 = vpack.c.bf16 %v82_v11, %v81_v10  ;;  %v631_v15 = vpack.c.bf16 %v84_v14, %v83_v13  ;;  %v85_v16 = vld [vmem:[#allocation5 + $0x50] sm:$0xff]  ;;  %v86_v17 = vld [vmem:[#allocation5 + $0x58] sm:$0xff]  ;;  %v87_v19 = vld [vmem:[#allocation5 + $0x60] sm:$0xff] }
  0x3b   :  { %620 = vmatprep.subr.bf16.mxu0 %v619_v5  ;;  %v635_v18 = vpack.c.bf16 %v86_v17, %v85_v16  ;;  %v88_v20 = vld [vmem:[#allocation5 + $0x68] sm:$0xff]  ;;  %v89_v22 = vld [vmem:[#allocation5 + $0x70] sm:$0xff]  ;;  %v90_v23 = vld [vmem:[#allocation5 + $0x78] sm:$0xff] }
  0x3c   :  { %v639_v21 = vpack.c.bf16 %v88_v20, %v87_v19  ;;  %v643_v24 = vpack.c.bf16 %v90_v23, %v89_v22  ;;  %v60_v25 = vld [vmem:[#allocation2 + $0x8] sm:$0xff]  ;;  %v61_v26 = vld [vmem:[#allocation2 + $0x10] sm:$0xff]  ;;  %v62_v27 = vld [vmem:[#allocation2 + $0x18] sm:$0xff] }
  0x3d   :  { %v63_v28 = vld [vmem:[#allocation2 + $0x20] sm:$0xff]  ;;  %v64_v29 = vld [vmem:[#allocation2 + $0x28] sm:$0xff]  ;;  %v65_v30 = vld [vmem:[#allocation2 + $0x30] sm:$0xff] }
  0x3e   :  { %622 = vmatpush3.bf16.msra.mxu0 %v619_v5  ;;  %v66_v31 = vld [vmem:[#allocation2 + $0x38] sm:$0xff]  ;;  %v67_v32 = vld [vmem:[#allocation2 + $0x40] sm:$0xff]  ;;  %v68_v33 = vld [vmem:[#allocation2 + $0x48] sm:$0xff] }
  0x3f   :  { %624 = vmatprep.subr.bf16.mxu0 %v623_v8  ;;  %v69_v34 = vld [vmem:[#allocation2 + $0x50] sm:$0xff]  ;;  %v70_v35 = vld [vmem:[#allocation2 + $0x58] sm:$0xff]  ;;  %v71_v36 = vld [vmem:[#allocation2 + $0x60] sm:$0xff] }
  0x40   :  { %v72_v37 = vld [vmem:[#allocation2 + $0x68] sm:$0xff]  ;;  %v73_v38 = vld [vmem:[#allocation2 + $0x70] sm:$0xff]  ;;  %v74_v39 = vld [vmem:[#allocation2 + $0x78] sm:$0xff] }
  0x41   :  { %v236_v40 = vld [vmem:[#allocation7] sm:$0xff]  ;;  %v237_v1 = vld [vmem:[#allocation7 + $0x8] sm:$0xff]  ;;  %v238_v2 = vld [vmem:[#allocation7 + $0x10] sm:$0xff] }
  0x42   :  { %626 = vmatpush3.bf16.msra.mxu0 %v623_v8  ;;  %591 = vmatprep.mubr.f32.mxu1 %v236_v40  ;;  %v239_v3 = vld [vmem:[#allocation7 + $0x18] sm:$0xff]  ;;  %v240_v4 = vld [vmem:[#allocation7 + $0x20] sm:$0xff]  ;;  %v241_v5 = vld [vmem:[#allocation7 + $0x28] sm:$0xff] }
  0x43   :  { %628 = vmatprep.subr.bf16.mxu0 %v627_v12  ;;  %v242_v6 = vld [vmem:[#allocation7 + $0x30] sm:$0xff]  ;;  %v243_v7 = vld [vmem:[#allocation7 + $0x38] sm:$0xff]  ;;  %v244_v8 = vld [vmem:[#allocation7 + $0x40] sm:$0xff] }
  0x44   :  { %v245_v9 = vld [vmem:[#allocation7 + $0x48] sm:$0xff]  ;;  %v246_v10 = vld [vmem:[#allocation7 + $0x50] sm:$0xff]  ;;  %v247_v11 = vld [vmem:[#allocation7 + $0x58] sm:$0xff] }
  0x45   :  { %v249_v13 = vld [vmem:[#allocation7 + $0x68] sm:$0xff]  ;;  %v250_v14 = vld [vmem:[#allocation7 + $0x70] sm:$0xff]  ;;  %v438_v16 = vld [vmem:[%s883_s3] ss:$0 sm:$0xff]  ;;  %s784_s3 = smov [#allocation8]  }
  0x46   :  { %630 = vmatpush3.bf16.msra.mxu0 %v627_v12  ;;  %v248_v12 = vld [vmem:[#allocation7 + $0x60] sm:$0xff]  ;;  %s425_s26 = sshll.u32 %s784_s3, 4  ;;  %s426_s26 = int_to_ptr.vmem [resolvable:$true] %s425_s26 }
  0x47   :  { %632 = vmatprep.subr.bf16.mxu0 %v631_v15  ;;  %s751_s29 = scalar_lea.vmem %s426_s26, 2048  ;;  %p756_p11 = scmp.lt.s32.totalorder %s426_s26, %s426_s26 }
  0x48   :  { %p752_p10 = scmp.ne.s32.totalorder %s426_s26, %s751_s29  ;;  %p757_p12 = scmp.lt.s32.totalorder %s751_s29, %s751_s29 }
  0x4a   :  { %634 = vmatpush3.bf16.msra.mxu0 %v631_v15  ;;  %v251_v15 = vld [vmem:[#allocation7 + $0x78] sm:$0xff]  ;;  %p758_p13 = por %p757_p12, %p756_p11 }
  0x4b   :  { %636 = vmatprep.subr.bf16.mxu0 %v635_v18 }
  0x4c   :  { %p759_p0 = pnand %p758_p13, %p752_p10 }
  0x4e   :  { %638 = vmatpush3.bf16.msra.mxu0 %v635_v18 }
  0x4f   :  { %640 = vmatprep.subr.bf16.mxu0 %v639_v21 }
  0x52   :  { %642 = vmatpush3.bf16.msra.mxu0 %v639_v21 }
  0x53   :  { %644 = vmatprep.subr.bf16.mxu0 %v643_v24 }
  0x56   :  { %646 = vmatpush3.bf16.msra.mxu0 %v643_v24 }
  0x59   :  { %536 = vmatmul.mubr.f32.vlgmr.msra.gmra.mrb[0].mxu0 %v60_v25 }
  0x5a   :  { %538 = vmatprep.mubr.f32.mxu0 %v61_v26 }
  0x5d   :  { %539 = vmatmul.mubr.f32.gmra.mrb[2].mxu0 %v62_v27 }
  0x5e   :  { %541 = vmatprep.mubr.f32.mxu0 %v63_v28 }
  0x61   :  { %542 = vmatmul.mubr.f32.gmra.mrb[4].mxu0 %v64_v29 }
  0x62   :  { %544 = vmatprep.mubr.f32.mxu0 %v65_v30 }
  0x65   :  { %545 = vmatmul.mubr.f32.gmra.mrb[6].mxu0 %v66_v31 }
  0x66   :  { %547 = vmatprep.mubr.f32.mxu0 %v67_v32 }
  0x69   :  { %548 = vmatmul.mubr.f32.gmra.mrb[8].mxu0 %v68_v33 }
  0x6a   :  { %550 = vmatprep.mubr.f32.mxu0 %v69_v34 }
  0x6d   :  { %551 = vmatmul.mubr.f32.gmra.mrb[10].mxu0 %v70_v35 }
  0x6e   :  { %553 = vmatprep.mubr.f32.mxu0 %v71_v36 }
  0x71   :  { %554 = vmatmul.mubr.f32.gmra.mrb[12].mxu0 %v72_v37 }
  0x72   :  { %556 = vmatprep.mubr.f32.mxu0 %v73_v38 }
  0x75   :  { %557 = vmatmul.mubr.f32.gmra.mrb[14].mxu0 %v74_v39 }
 0x12c   :  { %v537_v41 = vpop.f32.mrb[0].mxu0 }
 0x12d   :  { %v157_v42 = vpop.f32.mrb[1].mxu0 }
 0x12e   :  { %v647_v43 = vpack.c.bf16 %v537_v41, %v157_v42 }
 0x130   :  { %v540_v44 = vpop.f32.mrb[2].mxu0  ;;  %648 = vmatprep.subr.bf16.mxu1 %v647_v43 }
 0x131   :  { %v167_v45 = vpop.f32.mrb[3].mxu0  ;;  %650 = vmatpush3.bf16.msra.mxu1 %v647_v43 }
 0x132   :  { %v651_v46 = vpack.c.bf16 %v540_v44, %v167_v45 }
 0x134   :  { %v543_v47 = vpop.f32.mrb[4].mxu0  ;;  %652 = vmatprep.subr.bf16.mxu1 %v651_v46 }
 0x135   :  { %v177_v48 = vpop.f32.mrb[5].mxu0  ;;  %654 = vmatpush3.bf16.msra.mxu1 %v651_v46 }
 0x136   :  { %v655_v49 = vpack.c.bf16 %v543_v47, %v177_v48 }
 0x138   :  { %v546_v50 = vpop.f32.mrb[6].mxu0  ;;  %656 = vmatprep.subr.bf16.mxu1 %v655_v49 }
 0x139   :  { %v187_v51 = vpop.f32.mrb[7].mxu0  ;;  %658 = vmatpush3.bf16.msra.mxu1 %v655_v49 }
 0x13a   :  { %v659_v52 = vpack.c.bf16 %v546_v50, %v187_v51 }
 0x13c   :  { %v549_v53 = vpop.f32.mrb[8].mxu0  ;;  %660 = vmatprep.subr.bf16.mxu1 %v659_v52 }
 0x13d   :  { %v197_v54 = vpop.f32.mrb[9].mxu0  ;;  %662 = vmatpush3.bf16.msra.mxu1 %v659_v52 }
 0x13e   :  { %v663_v55 = vpack.c.bf16 %v549_v53, %v197_v54 }
 0x140   :  { %v552_v56 = vpop.f32.mrb[10].mxu0  ;;  %664 = vmatprep.subr.bf16.mxu1 %v663_v55 }
 0x141   :  { %v207_v57 = vpop.f32.mrb[11].mxu0  ;;  %666 = vmatpush3.bf16.msra.mxu1 %v663_v55 }
 0x142   :  { %v667_v58 = vpack.c.bf16 %v552_v56, %v207_v57 }
 0x144   :  { %v555_v59 = vpop.f32.mrb[12].mxu0  ;;  %668 = vmatprep.subr.bf16.mxu1 %v667_v58 }
 0x145   :  { %v217_v60 = vpop.f32.mrb[13].mxu0  ;;  %670 = vmatpush3.bf16.msra.mxu1 %v667_v58 }
 0x146   :  { %v671_v61 = vpack.c.bf16 %v555_v59, %v217_v60 }
 0x148   :  { %v558_v62 = vpop.f32.mrb[14].mxu0  ;;  %672 = vmatprep.subr.bf16.mxu1 %v671_v61 }
 0x149   :  { %v227_v63 = vpop.f32.mrb[15].mxu0  ;;  %674 = vmatpush3.bf16.msra.mxu1 %v671_v61 }
 0x14a   :  { %v675_v0 = vpack.c.bf16 %v558_v62, %v227_v63 }
 0x14c   :  { %676 = vmatprep.subr.bf16.mxu1 %v675_v0 }
 0x14d   :  { %678 = vmatpush3.bf16.msra.mxu1 %v675_v0 }
 0x150   :  { %592 = vmatmul.mubr.f32.vlgmr.msra.gmra.mrb[0].mxu1 %v237_v1 }
 0x151   :  { %594 = vmatprep.mubr.f32.mxu1 %v238_v2 }
 0x154   :  { %595 = vmatmul.mubr.f32.gmra.mrb[2].mxu1 %v239_v3 }
 0x155   :  { %597 = vmatprep.mubr.f32.mxu1 %v240_v4 }
 0x158   :  { %598 = vmatmul.mubr.f32.gmra.mrb[4].mxu1 %v241_v5 }
 0x159   :  { %600 = vmatprep.mubr.f32.mxu1 %v242_v6 }
 0x15c   :  { %601 = vmatmul.mubr.f32.gmra.mrb[6].mxu1 %v243_v7 }
 0x15d   :  { %603 = vmatprep.mubr.f32.mxu1 %v244_v8 }
 0x160   :  { %604 = vmatmul.mubr.f32.gmra.mrb[8].mxu1 %v245_v9 }
 0x161   :  { %606 = vmatprep.mubr.f32.mxu1 %v246_v10 }
 0x164   :  { %607 = vmatmul.mubr.f32.gmra.mrb[10].mxu1 %v247_v11 }
 0x165   :  { %609 = vmatprep.mubr.f32.mxu1 %v248_v12 }
 0x168   :  { %610 = vmatmul.mubr.f32.gmra.mrb[12].mxu1 %v249_v13 }
 0x169   :  { %612 = vmatprep.mubr.f32.mxu1 %v250_v14 }
 0x16c   :  { %613 = vmatmul.mubr.f32.gmra.mrb[14].mxu1 %v251_v15 }
 0x223   :  { %v593_v17 = vpop.f32.mrb[0].mxu1 }
 0x224   :  { %v331_v18 = vadd.f32 %v593_v17, %v438_v16  ;;  %v325_v19 = vpop.f32.mrb[1].mxu1 }
 0x225   :  { %v326_v20 = vadd.f32 %v438_v16, %v325_v19 }
 0x226   :  { %405 = vst [vmem:[#allocation8 + $0x8] sm:$0xff] %v331_v18 }
 0x227   :  { %404 = vst [vmem:[#allocation8] sm:$0xff] %v326_v20  ;;  %v596_v21 = vpop.f32.mrb[2].mxu1 }
 0x228   :  { %v341_v22 = vadd.f32 %v596_v21, %v438_v16  ;;  %v335_v23 = vpop.f32.mrb[3].mxu1 }
 0x229   :  { %v336_v24 = vadd.f32 %v438_v16, %v335_v23 }
 0x22a   :  { %407 = vst [vmem:[#allocation8 + $0x18] sm:$0xff] %v341_v22 }
 0x22b   :  { %406 = vst [vmem:[#allocation8 + $0x10] sm:$0xff] %v336_v24  ;;  %v599_v25 = vpop.f32.mrb[4].mxu1 }
 0x22c   :  { %v351_v26 = vadd.f32 %v599_v25, %v438_v16  ;;  %v345_v27 = vpop.f32.mrb[5].mxu1 }
 0x22d   :  { %v346_v28 = vadd.f32 %v438_v16, %v345_v27 }
 0x22e   :  { %409 = vst [vmem:[#allocation8 + $0x28] sm:$0xff] %v351_v26 }
 0x22f   :  { %408 = vst [vmem:[#allocation8 + $0x20] sm:$0xff] %v346_v28  ;;  %v602_v29 = vpop.f32.mrb[6].mxu1 }
 0x230   :  { %v361_v30 = vadd.f32 %v602_v29, %v438_v16  ;;  %v355_v31 = vpop.f32.mrb[7].mxu1 }
 0x231   :  { %v356_v32 = vadd.f32 %v438_v16, %v355_v31 }
 0x232   :  { %411 = vst [vmem:[#allocation8 + $0x38] sm:$0xff] %v361_v30 }
 0x233   :  { %410 = vst [vmem:[#allocation8 + $0x30] sm:$0xff] %v356_v32  ;;  %v605_v33 = vpop.f32.mrb[8].mxu1 }
 0x234   :  { %v371_v34 = vadd.f32 %v605_v33, %v438_v16  ;;  %v365_v35 = vpop.f32.mrb[9].mxu1 }
 0x235   :  { %v366_v36 = vadd.f32 %v438_v16, %v365_v35 }
 0x236   :  { %413 = vst [vmem:[#allocation8 + $0x48] sm:$0xff] %v371_v34 }
 0x237   :  { %412 = vst [vmem:[#allocation8 + $0x40] sm:$0xff] %v366_v36  ;;  %v608_v37 = vpop.f32.mrb[10].mxu1 }
 0x238   :  { %v381_v38 = vadd.f32 %v608_v37, %v438_v16  ;;  %v375_v39 = vpop.f32.mrb[11].mxu1 }
 0x239   :  { %v376_v40 = vadd.f32 %v438_v16, %v375_v39 }
 0x23a   :  { %415 = vst [vmem:[#allocation8 + $0x58] sm:$0xff] %v381_v38 }
 0x23b   :  { %414 = vst [vmem:[#allocation8 + $0x50] sm:$0xff] %v376_v40  ;;  %v611_v41 = vpop.f32.mrb[12].mxu1 }
 0x23c   :  { %v391_v42 = vadd.f32 %v611_v41, %v438_v16  ;;  %v385_v43 = vpop.f32.mrb[13].mxu1 }
 0x23d   :  { %v386_v44 = vadd.f32 %v438_v16, %v385_v43 }
 0x23e   :  { %417 = vst [vmem:[#allocation8 + $0x68] sm:$0xff] %v391_v42 }
 0x23f   :  { %416 = vst [vmem:[#allocation8 + $0x60] sm:$0xff] %v386_v44  ;;  %v614_v45 = vpop.f32.mrb[14].mxu1 }
 0x240   :  { %v401_v46 = vadd.f32 %v614_v45, %v438_v16  ;;  %v395_v47 = vpop.f32.mrb[15].mxu1 }
 0x241   :  { %v396_v48 = vadd.f32 %v438_v16, %v395_v47 }
 0x242   :  { %419 = vst [vmem:[#allocation8 + $0x78] sm:$0xff] %v401_v46 }
 0x243   :  { %418 = vst [vmem:[#allocation8 + $0x70] sm:$0xff] %v396_v48 }
 0x244   :  { %762 = shalt.err (!%p759_p0)
}
 0x245   :  { %s763_s6 = scalar_lea.hbm %s884_s4, 2048 }
 0x246   :  { %p764_p1 = scmp.ne.s32.totalorder %s884_s4, %s763_s6  ;;  %p767_p2 = scmp.lt.u32.totalorder %s763_s6, %s884_s4 }
 0x248   :  { %p769_p3 = pnand %p767_p2, %p764_p1 }
 0x24a   :  { %772 = shalt.err (!%p769_p3)
}
 0x24b   :  { %431 = dma.vmem_to_hbm [thread:$0]  %s426_s26, 2048, %s884_s4, [#allocation4], %s781_s27, %s781_s27, %s782_s28  }
 0x24c   :  { %777 = dma.done.wait [#allocation4], 2048  }
 0x24d   :  { %778 = vsyncadd [#allocation4], 4294965248 }
 0x24e   :  { %435 = vsyncpa [#allocation3], 1 }
 0x24f   :  { %436 = vsyncpa [#allocation6], 1 }
 0x250   :  { %437 = vsyncpa [#allocation4], 1 }

</bundles_post_ra>
